<compile_context>
chip_gen: v7x
topology: tpu7x:2x2x1
jax: 0.10.0
libtpu: 0.0.40
codegen_flags: <defaults>
</compile_context>

<pallas_src>
import functools
import re

import numpy as np
import jax
import jax.numpy as jnp
from jax.experimental import pallas as pl
from jax.experimental.pallas import tpu as pltpu

phoneme_inventory = ['aa', 'ae', 'ah', 'ao', 'aw', 'ax', 'axr', 'ay', 'b', 'ch',
                     'd', 'dh', 'dx', 'eh', 'el', 'em', 'en', 'er', 'ey', 'f',
                     'g', 'hh', 'hv', 'ih', 'iy', 'jh', 'k', 'l', 'm', 'n',
                     'nx', 'ng', 'ow', 'oy', 'p', 'r', 's', 'sh', 't', 'th',
                     'uh', 'uw', 'v', 'w', 'y', 'z', 'zh', 'sil']
NUM_CLASSES = len(phoneme_inventory)

# FLAGS.suptcon_epsilon is undefined in the reference snippet; fixed here.
SUPTCON_EPSILON = 1e-8


def _round_up(x, m):
    return (x + m - 1) // m * m


def _largest_divisor(n, cap, granule):
    """Largest multiple of `granule` that divides n and is <= cap."""
    best = granule
    t = granule
    while t <= min(cap, n):
        if n % t == 0:
            best = t
        t += granule
    return best


@functools.lru_cache(maxsize=1)
def _tpu_generation():
    """Best-effort TPU generation number (e.g. 5, 6, 7); 0 if unknown."""
    try:
        kind = jax.devices()[0].device_kind.lower()
    except Exception:
        return 0
    m = re.search(r"(\d+)", kind)
    return int(m.group(1)) if m else 0


def _suptcon_tile_kernel(pq_ref, pk_ref, xq_ref, xkT_ref, loss_ref,
                         num_acc, den_acc, *, B_valid, tq, tk, eps, exp_bf16):
    """One (tq query rows) x (tk key cols) tile of the exp-cos-sim matrix.

    Accumulates per-KEY-column partial sums; by symmetry of the full matrix
    (and the masks) the column sum for column c equals the reference's row sum
    for batch row c, so the (1, tk) accumulators / output are lane-dense.
    Inputs arrive pre-normalized (and pre-cast to bf16 on the fast path); the
    key operand arrives pre-transposed so the matmul is a plain A(tq,D)xB(D,tk).
    """
    kb = pl.program_id(0)          # key / output-column block (parallel)
    ib = pl.program_id(1)          # query / row block (reduction, last axis)

    @pl.when(ib == 0)
    def _init():
        num_acc[...] = jnp.zeros_like(num_acc)
        den_acc[...] = jnp.zeros_like(den_acc)

    # cosine-similarity tile on the MXU, f32 accumulation.
    sim = jax.lax.dot_general(xq_ref[...], xkT_ref[...],
                              (((1,), (0,)), ((), ())),
                              preferred_element_type=jnp.float32)   # (tq, tk)

    if exp_bf16:
        # bf16 EUP exp (v6e+/v7x only); accumulators stay f32.
        esim = jnp.exp(sim.astype(jnp.bfloat16)).astype(jnp.float32)
    else:
        esim = jnp.exp(sim)

    # Validity mask: drop the diagonal and padded query rows (fused selects).
    row = ib * tq + jax.lax.broadcasted_iota(jnp.int32, (tq, tk), 0)
    col = kb * tk + jax.lax.broadcasted_iota(jnp.int32, (tq, tk), 1)
    valid = (row != col) & (row < B_valid)
    masked = jnp.where(valid, esim, 0.0)

    # Query labels: slice the resident (Bp,1) block for this row tile.
    q_start = pl.multiple_of(ib * tq, tq)
    pq = pq_ref[pl.ds(q_start, tq), :]                    # (tq, 1)
    same_cls = pq == pk_ref[...]                          # (tq,1)==(1,tk) -> (tq,tk)

    den_acc[...] += jnp.sum(masked, axis=0, keepdims=True)                 # (1, tk)
    num_acc[...] += jnp.sum(jnp.where(same_cls, masked, 0.0),
                            axis=0, keepdims=True)                          # (1, tk)

    @pl.when(ib == pl.num_programs(1) - 1)
    def _finalize():
        loss_ref[...] = -jnp.log(num_acc[...] *
                                 pl.reciprocal(den_acc[...] + eps))


def per_row_suptcon_loss(embeddings, phonemes, *, use_bf16=True,
                         eps=SUPTCON_EPSILON):
    """Per-row -log(num/(den+eps)) via a tiled Pallas kernel.  Returns (B,)."""
    B, D = embeddings.shape
    gen = _tpu_generation()

    # Tile selection:
    #   small B  -> single (Bp, Bp) tile, Bp rounded up to the 8-sublane granule
    #               (block dims equal the full array dims -> (8,128) rule holds).
    #   large B  -> pad Bp to a multiple of 128; tk = largest mult-of-128 divisor
    #               <= 512 (resident key block, read once per kb); tq = largest
    #               mult-of-8 divisor <= 256 (streamed query block).  On v7x the
    #               key cap is lowered so nk >= 2 (two TensorCores).
    if B <= 128:
        Bp = _round_up(B, 8)
        tq = tk = Bp
    else:
        Bp = _round_up(B, 128)
        cap_k = 512
        if gen >= 7 and Bp >= 256:
            cap_k = min(cap_k, Bp // 2)       # keep >=2 parallel key blocks
        tk = _largest_divisor(Bp, cap_k, 128)
        tq = _largest_divisor(Bp, 256, 8)
    nk = Bp // tk
    ni = Bp // tq

    # Hoisted (one-time) L2 normalization; pad; optional bf16 cast (halves DMA
    # bytes and the double-buffered operand footprint in VMEM).
    emb = embeddings.astype(jnp.float32)
    emb = emb / jnp.maximum(jnp.linalg.norm(emb, axis=1, keepdims=True), 1e-12)
    phon = phonemes.astype(jnp.int32)
    if Bp != B:
        emb = jnp.pad(emb, ((0, Bp - B), (0, 0)))           # zero pad rows
        phon = jnp.pad(phon, (0, Bp - B), constant_values=-1)
    if use_bf16:
        emb = emb.astype(jnp.bfloat16)
    emb_t = emb.T                                            # (D, Bp) key operand

    phon_col = phon.reshape(Bp, 1)                           # query labels
    phon_row = phon.reshape(1, Bp)                           # key labels

    exp_bf16 = bool(use_bf16 and gen >= 6)   # bf16 EUP exp only on v6e+/v7x

    kernel = functools.partial(_suptcon_tile_kernel, B_valid=B, tq=tq, tk=tk,
                               eps=eps, exp_bf16=exp_bf16)

    itemsize = 2 if use_bf16 else 4
    cost = pl.CostEstimate(
        flops=2 * Bp * Bp * D,
        transcendentals=Bp * Bp,
        bytes_accessed=int(Bp * D * itemsize * (nk + 1) + 3 * Bp * 4),
    )

    # v4/v5e/v6e have 128 MiB physical VMEM -> 64 MiB scoped; v7x (64 MiB
    # physical) / unknown -> 32 MiB.
    vmem_limit = (64 if 4 <= gen <= 6 else 32) * 1024 * 1024

    out = pl.pallas_call(
        kernel,
        out_shape=jax.ShapeDtypeStruct((1, Bp), jnp.float32),
        grid_spec=pltpu.PrefetchScalarGridSpec(
            num_scalar_prefetch=0,
            grid=(nk, ni),
            in_specs=[
                pl.BlockSpec((Bp, 1), lambda kb, ib: (0, 0)),   # query labels (resident)
                pl.BlockSpec((1, tk), lambda kb, ib: (0, kb)),  # key labels
                pl.BlockSpec((tq, D), lambda kb, ib: (ib, 0)),  # query rows (streamed)
                pl.BlockSpec((D, tk), lambda kb, ib: (0, kb)),  # key cols (pre-transposed)
            ],
            out_specs=pl.BlockSpec((1, tk), lambda kb, ib: (0, kb)),
            scratch_shapes=[pltpu.VMEM((1, tk), jnp.float32),   # num acc
                            pltpu.VMEM((1, tk), jnp.float32)],  # den acc
        ),
        compiler_params=pltpu.CompilerParams(
            dimension_semantics=("parallel", "arbitrary"),
            vmem_limit_bytes=vmem_limit,
        ),
        cost_estimate=cost,
    )(phon_col, phon_row, emb, emb_t)
    return out[0, :B]


@functools.partial(jax.jit, static_argnames=("use_bf16",))
def _weighted_loss_device(embeddings, phonemes, weight_vec, use_bf16=True):
    """Device-side epilogue: per-class means + dict weights, fully jit-able."""
    row_loss = per_row_suptcon_loss(embeddings, phonemes, use_bf16=use_bf16)
    phon = phonemes.astype(jnp.int32)
    class_sum = jax.ops.segment_sum(row_loss, phon, num_segments=NUM_CLASSES)
    counts = jax.ops.segment_sum(jnp.ones_like(row_loss), phon,
                                 num_segments=NUM_CLASSES)
    present = counts > 0
    class_mean = class_sum / jnp.where(present, counts, 1.0)
    weighted = jnp.where(present, class_mean * weight_vec, 0.0)
    n_classes = jnp.sum(present.astype(jnp.float32))
    return jnp.sum(weighted) / n_classes


def weighted_suptcon_loss(embeddings, phonemes, weights, *, use_bf16=True):
    """Full loss matching WeightedSupTConLoss.forward semantics."""
    weight_vec = jnp.asarray(
        np.array([weights.get(lbl, 1.0) for lbl in phoneme_inventory],
                 dtype=np.float32))
    return _weighted_loss_device(embeddings, phonemes, weight_vec,
                                 use_bf16=use_bf16)


def _reference_numpy(embeddings, phonemes, weights):
    """Pure-numpy float64 reference reproducing the PyTorch forward."""
    x = np.asarray(embeddings, dtype=np.float64)
    ph = np.asarray(phonemes)
    B = x.shape[0]
    xn = x / np.maximum(np.linalg.norm(x, axis=1, keepdims=True), 1e-12)
    exp_sim = np.exp(xn @ xn.T)
    eye = np.eye(B, dtype=bool)
    classes = np.unique(ph)
    total = 0.0
    for c in classes:
        cm = ph == c
        pos = np.outer(cm, cm) & ~eye
        num = (exp_sim * pos).sum(axis=1)[cm]
        den = (exp_sim * ~eye).sum(axis=1)[cm]
        cl = (-np.log(num / (den + SUPTCON_EPSILON))).mean()
        total += cl * weights.get(phoneme_inventory[int(c)], 1.0)
    return total / len(classes)


if __name__ == "__main__":
    key = jax.random.PRNGKey(0)
    weights = {'aa': 2.0, 'ae': 0.5, 'ah': 1.5, 'sil': 0.25}

    k1, k2 = jax.random.split(key)

    # case 1: B=8 (single tile), D=32; every class has >=2 members.
    emb1 = jax.random.normal(k1, (8, 32), dtype=jnp.float32)
    phon1 = jnp.array([0, 0, 1, 1, 2, 2, 47, 47], dtype=jnp.int32)

    # case 2: B=12 (padded to 16 -> exercises the pad / validity mask), D=48.
    emb2 = jax.random.normal(k2, (12, 48), dtype=jnp.float32)
    phon2 = jnp.array([0, 0, 3, 3, 3, 5, 5, 7, 7, 7, 10, 10], dtype=jnp.int32)

    for emb, phon in ((emb1, phon1), (emb2, phon2)):
        ref = _reference_numpy(np.asarray(emb), np.asarray(phon), weights)

        # exact-math path (f32 MXU operands, f32 exp)
        loss_f32 = jax.block_until_ready(
            weighted_suptcon_loss(emb, phon, weights, use_bf16=False))
        assert np.allclose(float(loss_f32), ref, rtol=1e-4, atol=1e-5), \
            ("f32 path mismatch", float(loss_f32), ref)

        # fast path (bf16 pre-normalized operands; bf16 exp on v6e+)
        loss_bf16 = jax.block_until_ready(
            weighted_suptcon_loss(emb, phon, weights, use_bf16=True))
        assert np.allclose(float(loss_bf16), ref, rtol=3e-2, atol=3e-3), \
            ("bf16 path mismatch", float(loss_bf16), ref)

    print("KERNEL_OK")
</pallas_src>

<mosaic_0001>
module attributes {stable_mosaic.version = 11 : i64} {
  func.func @_suptcon_tile_kernel(%arg0: i32, %arg1: i32, %arg2: memref<8x1xi32, #tpu.memory_space<vmem>>, %arg3: memref<1x8xi32, #tpu.memory_space<vmem>>, %arg4: memref<8x32xf32, #tpu.memory_space<vmem>>, %arg5: memref<32x8xf32, #tpu.memory_space<vmem>>, %arg6: memref<1x8xf32, #tpu.memory_space<vmem>>, %arg7: memref<1x8xf32, #tpu.memory_space<vmem>>, %arg8: memref<1x8xf32, #tpu.memory_space<vmem>>) attributes {dimension_semantics = [#tpu.dimension_semantics<parallel>, #tpu.dimension_semantics<arbitrary>], iteration_bounds = array<i64: 1, 1>, scalar_prefetch = 0 : i64, scratch_operands = 2 : i64, tpu.core_type = #tpu.core_type<tc>, window_params = [{pipeline_mode = #tpu.pipeline_mode<synchronous>, transform_indices = @transform_0, window_bounds = array<i64: 8, 1>}, {transform_indices = @transform_1, window_bounds = array<i64: 1, 8>}, {transform_indices = @transform_2, window_bounds = array<i64: 8, 32>}, {transform_indices = @transform_3, window_bounds = array<i64: 32, 8>}, {transform_indices = @transform_4, window_bounds = array<i64: 1, 8>}]} {
    %c0_i32 = arith.constant 0 : i32
    %0 = arith.cmpi eq, %arg1, %c0_i32 : i32
    %1 = arith.extui %0 : i1 to i32
    %c0_i32_0 = arith.constant 0 : i32
    %2 = arith.cmpi ne, %1, %c0_i32_0 : i32
    scf.if %2 {
      %cst_24 = arith.constant 0.000000e+00 : f32
      %44 = vector.broadcast %cst_24 : f32 to vector<1x8xf32>
      %c0_25 = arith.constant 0 : index
      %c0_26 = arith.constant 0 : index
      %45 = vector.load %arg7[%c0_25, %c0_26] : memref<1x8xf32, #tpu.memory_space<vmem>>, vector<1x8xf32>
      tpu.vector_store %arg7[%c0_25, %c0_26], %44 {strides = array<i32>} : memref<1x8xf32, #tpu.memory_space<vmem>>, vector<1x8xf32>,
      %cst_27 = arith.constant 0.000000e+00 : f32
      %46 = vector.broadcast %cst_27 : f32 to vector<1x8xf32>
      %c0_28 = arith.constant 0 : index
      %c0_29 = arith.constant 0 : index
      %47 = vector.load %arg8[%c0_28, %c0_29] : memref<1x8xf32, #tpu.memory_space<vmem>>, vector<1x8xf32>
      tpu.vector_store %arg8[%c0_28, %c0_29], %46 {strides = array<i32>} : memref<1x8xf32, #tpu.memory_space<vmem>>, vector<1x8xf32>,
    } else {
    }
    %c0 = arith.constant 0 : index
    %c0_1 = arith.constant 0 : index
    %3 = vector.load %arg4[%c0, %c0_1] : memref<8x32xf32, #tpu.memory_space<vmem>>, vector<8x32xf32>
    %c0_2 = arith.constant 0 : index
    %c0_3 = arith.constant 0 : index
    %4 = vector.load %arg5[%c0_2, %c0_3] : memref<32x8xf32, #tpu.memory_space<vmem>>, vector<32x8xf32>
    %cst = arith.constant dense<0.000000e+00> : vector<8x8xf32>
    %5 = tpu.matmul %3, %4, %cst {dimension_numbers = #tpu.dot_dimension_numbers<[1], [0], [0], [1], [0, 0, 1, 1], [], []>} : vector<8x32xf32>, vector<32x8xf32>, vector<8x8xf32> -> vector<8x8xf32>
    %6 = math.exp %5 : vector<8x8xf32>
    %c8_i32 = arith.constant 8 : i32
    %7 = arith.muli %arg1, %c8_i32 : i32
    %8 = tpu.iota {dimensions = array<i32: 0>} : vector<8x8xi32>
    %9 = vector.broadcast %7 : i32 to vector<8x8xi32>
    %10 = arith.addi %9, %8 : vector<8x8xi32>
    %c8_i32_4 = arith.constant 8 : i32
    %11 = arith.muli %arg0, %c8_i32_4 : i32
    %12 = tpu.iota {dimensions = array<i32: 1>} : vector<8x8xi32>
    %13 = vector.broadcast %11 : i32 to vector<8x8xi32>
    %14 = arith.addi %13, %12 : vector<8x8xi32>
    %15 = arith.cmpi ne, %10, %14 : vector<8x8xi32>
    %c8_i32_5 = arith.constant 8 : i32
    %16 = vector.broadcast %c8_i32_5 : i32 to vector<8x8xi32>
    %17 = arith.cmpi slt, %10, %16 : vector<8x8xi32>
    %18 = arith.andi %15, %17 : vector<8x8xi1>
    %cst_6 = arith.constant 0.000000e+00 : f32
    %19 = vector.broadcast %cst_6 : f32 to vector<8x8xf32>
    %20 = arith.select %18, %6, %19 : vector<8x8xi1>, vector<8x8xf32>
    %c8_i32_7 = arith.constant 8 : i32
    %21 = arith.muli %arg1, %c8_i32_7 : i32
    %22 = tpu.assume_multiple %21, 8 : i32
    %23 = arith.index_cast %22 : i32 to index
    %c0_8 = arith.constant 0 : index
    %24 = vector.load %arg2[%23, %c0_8] : memref<8x1xi32, #tpu.memory_space<vmem>>, vector<8x1xi32>
    %c0_9 = arith.constant 0 : index
    %c0_10 = arith.constant 0 : index
    %25 = vector.load %arg3[%c0_9, %c0_10] : memref<1x8xi32, #tpu.memory_space<vmem>>, vector<1x8xi32>
    %26 = vector.broadcast %24 : vector<8x1xi32> to vector<8x8xi32>
    %27 = vector.broadcast %25 : vector<1x8xi32> to vector<8x8xi32>
    %28 = arith.cmpi eq, %26, %27 : vector<8x8xi32>
    %c0_11 = arith.constant 0 : index
    %c0_12 = arith.constant 0 : index
    %29 = vector.load %arg8[%c0_11, %c0_12] : memref<1x8xf32, #tpu.memory_space<vmem>>, vector<1x8xf32>
    %cst_13 = arith.constant dense<0.000000e+00> : vector<8xf32>
    %30 = vector.multi_reduction <add>, %20, %cst_13 [0] : vector<8x8xf32> to vector<8xf32>
    %31 = vector.shape_cast %30 : vector<8xf32> to vector<1x8xf32>
    %32 = arith.addf %29, %31 : vector<1x8xf32>
    %c0_14 = arith.constant 0 : index
    %c0_15 = arith.constant 0 : index
    %33 = vector.load %arg8[%c0_14, %c0_15] : memref<1x8xf32, #tpu.memory_space<vmem>>, vector<1x8xf32>
    tpu.vector_store %arg8[%c0_14, %c0_15], %32 {strides = array<i32>} : memref<1x8xf32, #tpu.memory_space<vmem>>, vector<1x8xf32>,
    %c0_16 = arith.constant 0 : index
    %c0_17 = arith.constant 0 : index
    %34 = vector.load %arg7[%c0_16, %c0_17] : memref<1x8xf32, #tpu.memory_space<vmem>>, vector<1x8xf32>
    %cst_18 = arith.constant 0.000000e+00 : f32
    %35 = vector.broadcast %cst_18 : f32 to vector<8x8xf32>
    %36 = arith.select %28, %20, %35 : vector<8x8xi1>, vector<8x8xf32>
    %cst_19 = arith.constant dense<0.000000e+00> : vector<8xf32>
    %37 = vector.multi_reduction <add>, %36, %cst_19 [0] : vector<8x8xf32> to vector<8xf32>
    %38 = vector.shape_cast %37 : vector<8xf32> to vector<1x8xf32>
    %39 = arith.addf %34, %38 : vector<1x8xf32>
    %c0_20 = arith.constant 0 : index
    %c0_21 = arith.constant 0 : index
    %40 = vector.load %arg7[%c0_20, %c0_21] : memref<1x8xf32, #tpu.memory_space<vmem>>, vector<1x8xf32>
    tpu.vector_store %arg7[%c0_20, %c0_21], %39 {strides = array<i32>} : memref<1x8xf32, #tpu.memory_space<vmem>>, vector<1x8xf32>,
    %c0_i32_22 = arith.constant 0 : i32
    %41 = arith.cmpi eq, %arg1, %c0_i32_22 : i32
    %42 = arith.extui %41 : i1 to i32
    %c0_i32_23 = arith.constant 0 : i32
    %43 = arith.cmpi ne, %42, %c0_i32_23 : i32
    scf.if %43 {
      %c0_24 = arith.constant 0 : index
      %c0_25 = arith.constant 0 : index
      %44 = vector.load %arg7[%c0_24, %c0_25] : memref<1x8xf32, #tpu.memory_space<vmem>>, vector<1x8xf32>
      %c0_26 = arith.constant 0 : index
      %c0_27 = arith.constant 0 : index
      %45 = vector.load %arg8[%c0_26, %c0_27] : memref<1x8xf32, #tpu.memory_space<vmem>>, vector<1x8xf32>
      %cst_28 = arith.constant 9.99999993E-9 : f32
      %46 = vector.broadcast %cst_28 : f32 to vector<1x8xf32>
      %47 = arith.addf %45, %46 : vector<1x8xf32>
      %48 = tpu.reciprocal %47 : vector<1x8xf32> -> vector<1x8xf32>
      %49 = arith.mulf %44, %48 : vector<1x8xf32>
      %50 = math.log %49 : vector<1x8xf32>
      %cst_29 = arith.constant 0.000000e+00 : f32
      %51 = vector.broadcast %cst_29 : f32 to vector<1x8xf32>
      %52 = arith.subf %51, %50 : vector<1x8xf32>
      %c0_30 = arith.constant 0 : index
      %c0_31 = arith.constant 0 : index
      %53 = vector.load %arg6[%c0_30, %c0_31] : memref<1x8xf32, #tpu.memory_space<vmem>>, vector<1x8xf32>
      tpu.vector_store %arg6[%c0_30, %c0_31], %52 {strides = array<i32>} : memref<1x8xf32, #tpu.memory_space<vmem>>, vector<1x8xf32>,
    } else {
    }
    return
  }
  func.func @transform_0(%arg0: i32, %arg1: i32) -> (i32, i32) {
    %c0_i32 = arith.constant 0 : i32
    %c0_i32_0 = arith.constant 0 : i32
    %c0_i32_1 = arith.constant 0 : i32
    return %c0_i32, %c0_i32_0 : i32, i32
  }
  func.func @transform_1(%arg0: i32, %arg1: i32) -> (i32, i32) {
    %c0_i32 = arith.constant 0 : i32
    %c0_i32_0 = arith.constant 0 : i32
    return %c0_i32, %arg0 : i32, i32
  }
  func.func @transform_2(%arg0: i32, %arg1: i32) -> (i32, i32) {
    %c0_i32 = arith.constant 0 : i32
    %c0_i32_0 = arith.constant 0 : i32
    return %arg1, %c0_i32 : i32, i32
  }
  func.func @transform_3(%arg0: i32, %arg1: i32) -> (i32, i32) {
    %c0_i32 = arith.constant 0 : i32
    %c0_i32_0 = arith.constant 0 : i32
    return %c0_i32, %arg0 : i32, i32
  }
  func.func @transform_4(%arg0: i32, %arg1: i32) -> (i32, i32) {
    %c0_i32 = arith.constant 0 : i32
    %c0_i32_0 = arith.constant 0 : i32
    return %c0_i32, %arg0 : i32, i32
  }
}

</mosaic_0001>

<bundles_post_ra>
// kernel: _weighted_loss_device.1
= control target key start
LH: loop header
LB: loop body
LE: loop exit
PB: predicated region body
PF: predicated region fallthrough
CT: control target
= control target key end

     0   :  { %vm21_vm0 = vcmask 57344   ;;  %v204_v0 = vmov 0.0|0.0   ;;  %v205_v4 = vmov 0.0   ;;  %vm206_vm1 = vmmov 0   ;;  %s262_s3 = inlined_call_operand.vmem [shape: f32[32,8], index: 3, kind: input, shape index: {}]   ;;  %s263_s0 = inlined_call_operand.vmem [shape: s32[8,1], index: 0, kind: input, shape index: {}]   ;;  %s264_s2 = inlined_call_operand.vmem [shape: f32[8,32], index: 2, kind: input, shape index: {}]   ;;  %s265_s1 = inlined_call_operand.vmem [shape: s32[1,8], index: 1, kind: input, shape index: {}]   ;;  %s266_s4 = inlined_call_operand.vmem [shape: f32[1,8], index: 4, kind: output, shape index: {}]  }
   0x1   :  { %187 = vmatprep.subr.bf16.mxu0 %v204_v0  ;;  %v25_v1 = vld [vmem:[%s262_s3] sm:$0xff]  ;;  %v26_v2 = vld [vmem:[%s262_s3 + $0x8] sm:$0xff]  ;;  %v27_v3 = vld [vmem:[%s262_s3 + $0x10] sm:$0xff]  ;;  %22 = vst.msk [vmem:[#allocation2] sm:$0x1] %vm21_vm0, %v205_v4  ;;  %184 = vmatprep.mubr.msk.f32.mxu0 %vm206_vm1, %v205_v4  ;;  %v207_v7 = vmov 0   ;;  %v106_v14 = vlaneseq }
   0x2   :  { %23 = vst.msk [vmem:[#allocation3] sm:$0x1] %vm21_vm0, %v205_v4  ;;  %v188_v5 = vpack.c.bf16 %v26_v2, %v25_v1  ;;  %v28_v6 = vld [vmem:[%s262_s3 + $0x18] sm:$0xff]  ;;  %197 = vset.pattern.permute.xlu0 %v207_v7  ;;  %v120_v8 = vld [vmem:[%s263_s0] sm:$0xff]  ;;  %vm29_vm2 = vcmask 261120   ;;  %vm131_vm4 = vcmask 64512  }
   0x3   :  { %123 = vperm.xlu0 %197, %v120_v8   ;;  %v191_v9 = vpack.c.bf16 %v28_v6, %v27_v3  ;;  %v24_v10 = vld [vmem:[%s264_s2] sm:$0xff]  ;;  %v107_v15 = vshrl.u32 %v106_v14, 7  ;;  %v112_v16 = vand.u32 127, %v106_v14 }
   0x4   :  { %189 = vmatpush3.bf16.msra.mxu0 %v188_v5  ;;  %v170_v17 = vld [vmem:[%s265_s1] ss:$0 sm:$0xff] }
   0x5   :  { %190 = vmatprep.subr.bf16.mxu0 %v204_v0  ;;  %vm115_vm3 = vcmp.ne.s32.totalorder %v107_v15, %v112_v16 }
   0x8   :  { %192 = vmatpush3.bf16.msra.mxu0 %v191_v9  ;;  %v142_v36 = vld [vmem:[#allocation2] sm:$0x1] }
   0x9   :  { %v130_v33 = vld [vmem:[#allocation3] sm:$0x1] }
   0xb   :  { %185 = vmatmul.mubr.msk.f32.vlgmr.msra.gmra.mrb[0].mxu0 %vm29_vm2, %v24_v10 }
  0x82   :  { %v124_v18 = vpop.permute.xlu0 %123 }
  0x83   :  { %vm129_vm5 = vcmp.eq.s32.totalorder %v124_v18, %v170_v17 }
  0xde   :  { %v99_v11 = vpop.f32.mrb[0].mxu0 }
  0xdf   :  { %v103_v12 = vmul.f32 1.442695, %v99_v11  ;;  %v186_v13 = vpop.f32.mrb[1].mxu0 }
  0xe1   :  { %198 = vpow2.f32 %v103_v12 }
  0xeb   :  { %v199_v19 = vpop.eup %198 }
  0xec   :  { %v118_v20 = vsel %vm115_vm3, %v199_v19, 0.0 }
  0xed   :  { %v132_v21 = vsel %vm131_vm4, %v118_v20, 0.0  ;;  %v143_v22 = vsel %vm129_vm5, %v118_v20, 0.0 }
  0xee   :  { %v133_v23 = vrot.slane %v132_v21, 4  ;;  %v144_v24 = vsel %vm131_vm4, %v143_v22, 0.0 }
  0xef   :  { %v145_v25 = vrot.slane %v144_v24, 4 }
  0xf0   :  { %v134_v26 = vadd.f32 %v133_v23, %v132_v21 }
  0xf1   :  { %v146_v27 = vadd.f32 %v145_v25, %v144_v24 }
  0xf2   :  { %v135_v28 = vrot.slane %v134_v26, 2 }
  0xf3   :  { %v147_v29 = vrot.slane %v146_v27, 2 }
  0xf4   :  { %v136_v30 = vadd.f32 %v135_v28, %v134_v26 }
  0xf5   :  { %v148_v31 = vadd.f32 %v147_v29, %v146_v27 }
  0xf6   :  { %v137_v32 = vrot.slane %v136_v30, 1 }
  0xf7   :  { %v149_v34 = vrot.slane %v148_v31, 1 }
  0xf8   :  { %v138_v35 = vadd.f32 %v137_v32, %v136_v30 }
  0xf9   :  { %v150_v37 = vadd.f32 %v149_v34, %v148_v31 }
  0xfa   :  { %v139_v38 = vadd.f32 %v138_v35, %v130_v33 }
  0xfb   :  { %v151_v39 = vadd.f32 %v150_v37, %v142_v36 }
  0xfc   :  { %141 = vst.msk [vmem:[#allocation3] sm:$0x1] %vm21_vm0, %v139_v38 }
  0xfd   :  { %152 = vst.msk [vmem:[#allocation2] sm:$0x1] %vm21_vm0, %v151_v39 }
 0x103   :  { %v157_v40 = vld [vmem:[#allocation3] sm:$0x1] }
 0x104   :  { %v158_v41 = vadd.f32 1e-08, %v157_v40  ;;  %v156_v43 = vld [vmem:[#allocation2] sm:$0x1] }
 0x106   :  { %200 = vrcp.f32 %v158_v41 }
 0x110   :  { %v201_v42 = vpop.eup %200 }
 0x111   :  { %v160_v44 = vmul.f32 %v201_v42, %v156_v43 }
 0x113   :  { %202 = vlog2.f32 %v160_v44 }
 0x11d   :  { %v203_v45 = vpop.eup %202 }
 0x11e   :  { %v162_v46 = vmul.f32 0.6931472, %v203_v45 }
 0x120   :  { %v163_v47 = vsub.f32 0.0, %v162_v46 }
 0x122   :  { %164 = vst.msk [vmem:[%s266_s4] sm:$0x1] %vm21_vm0, %v163_v47 }

</bundles_post_ra>
